<compile_context>
chip_gen: v7x
topology: tpu7x:2x2x1
jax: 0.10.0
libtpu: 0.0.40
codegen_flags: <defaults>
</compile_context>

<pallas_src>
import functools

import jax
import jax.numpy as jnp
from jax.experimental import pallas as pl
from jax.experimental.pallas import tpu as pltpu


def yolo_loss_kernel(pred_ref, tgt_ref, loss_ref, acc_ref, *,
                     S, B, C, n, tile, l_coord, l_noobj):
    """Per-tile YOLO loss, accumulated as a (1, tile) lane vector in VMEM.

    pred_ref/tgt_ref: (D, tile) lane-dense blocks (cells on the lane axis).
    loss_ref: (1, 1) SMEM scalar output (written only on the last step).
    acc_ref:  (1, tile) f32 VMEM accumulator.
    """
    @pl.when(pl.program_id(0) == 0)
    def _init():
        acc_ref[...] = jnp.zeros_like(acc_ref)

    pred = pred_ref[...].astype(jnp.float32)   # (D, tile)
    tgt = tgt_ref[...].astype(jnp.float32)     # (D, tile)

    inv_S = 1.0 / S

    conf_t0 = tgt[4:5, :]                      # target confidence of box 0
    if n % tile != 0:
        # Mask the ragged last tile (n is a static Python int).
        col = (pl.program_id(0) * tile
               + jax.lax.broadcasted_iota(jnp.int32, (1, tile), 1))
        valid = col < n
        coo = (conf_t0 > 0.0) & valid          # cells containing an object
        noo = (conf_t0 == 0.0) & valid         # cells with no object
    else:
        coo = conf_t0 > 0.0
        noo = conf_t0 == 0.0

    # ---- 4th term (part II): no-object confidence loss (channels 4 & 9) ----
    d4 = pred[4:5, :] - tgt[4:5, :]
    d9 = pred[9:10, :] - tgt[9:10, :]
    noo_vec = jnp.where(noo, d4 * d4 + d9 * d9, 0.0)            # (1, tile)

    # ---- 5th term: class loss over object cells ----
    dc = pred[5 * B:, :] - tgt[5 * B:, :]                       # (C, tile)
    class_vec = jnp.sum(jnp.where(coo, dc * dc, 0.0),
                        axis=0, keepdims=True)                  # (1, tile)

    # ---- 3rd term: contain (responsible-box IOU) loss ----
    # target box 0 -> [x1, y1, x2, y2]
    txs = tgt[0:1, :] * inv_S
    tys = tgt[1:2, :] * inv_S
    tw2 = 0.5 * tgt[2:3, :]
    th2 = 0.5 * tgt[3:4, :]
    tx1 = txs - tw2
    tx2 = txs + tw2
    ty1 = tys - th2
    ty2 = tys + th2
    t_area = (tx2 - tx1) * (ty2 - ty1)

    ious = []
    confs = []
    for b in range(B):
        o = 5 * b
        pxs = pred[o:o + 1, :] * inv_S
        pys = pred[o + 1:o + 2, :] * inv_S
        pw2 = 0.5 * pred[o + 2:o + 3, :]
        ph2 = 0.5 * pred[o + 3:o + 4, :]
        px1 = pxs - pw2
        px2 = pxs + pw2
        py1 = pys - ph2
        py2 = pys + ph2
        iw = jnp.maximum(jnp.minimum(px2, tx2) - jnp.maximum(px1, tx1), 0.0)
        ih = jnp.maximum(jnp.minimum(py2, ty2) - jnp.maximum(py1, ty1), 0.0)
        inter = iw * ih
        p_area = (px2 - px1) * (py2 - py1)
        denom = jnp.maximum(p_area + t_area - inter, 1e-12)     # NaN guard
        ious.append(inter / denom)
        confs.append(pred[o + 4:o + 5, :])

    # argmax over the B boxes; ties pick the first maximum (matches torch.max)
    max_iou = ious[0]
    resp_conf = confs[0]
    for b in range(1, B):
        better = ious[b] > max_iou
        resp_conf = jnp.where(better, confs[b], resp_conf)
        max_iou = jnp.where(better, ious[b], max_iou)

    dcontain = resp_conf - max_iou
    contain_vec = jnp.where(coo, dcontain * dcontain, 0.0)      # (1, tile)

    # loc_loss and not_response_loss are identically 0 in the reference forward
    partial = 2.0 * contain_vec + l_noobj * noo_vec + class_vec
    acc_ref[...] += partial

    @pl.when(pl.program_id(0) == pl.num_programs(0) - 1)
    def _finalize():
        # single cross-lane reduction at the very end
        loss_ref[0, 0] = jnp.sum(acc_ref[...])


def _round_up(x, m):
    return ((x + m - 1) // m) * m


def yolo_loss(prediction, target, *, S, B, C, l_coord, l_noobj,
              max_tile_cells=8192):
    """prediction/target: (bs, S, S, 5*B + C) float. Returns scalar loss."""
    assert B == 2, "no-object term hardcodes confidence channels 4 and 9 (B=2)"
    bs = prediction.shape[0]
    D = 5 * B + C
    n = prediction.shape[0] * prediction.shape[1] * prediction.shape[2]

    # Lane-dense layout: cells on the last (lane) axis, channels on sublanes.
    pred_t = prediction.reshape(n, D).T.astype(jnp.float32)   # (D, n)
    tgt_t = target.reshape(n, D).T.astype(jnp.float32)        # (D, n)

    # Large cell tiles (multiple of 128 lanes); ragged tail is masked in-kernel
    # instead of padding (avoids an extra HBM read+write of both tensors).
    tile = min(_round_up(n, 128), _round_up(max_tile_cells, 128))
    n_tiles = pl.cdiv(n, tile)

    kernel = functools.partial(
        yolo_loss_kernel, S=S, B=B, C=C, n=n, tile=tile,
        l_coord=l_coord, l_noobj=l_noobj)

    # TODO(synk): for v7x megacore, emit per-tile lane-dense partials with a
    #             "parallel" grid axis instead of a serial accumulator.
    loss = pl.pallas_call(
        kernel,
        out_shape=jax.ShapeDtypeStruct((1, 1), jnp.float32),
        grid=(n_tiles,),
        in_specs=[
            pl.BlockSpec((D, tile), lambda i: (0, i)),
            pl.BlockSpec((D, tile), lambda i: (0, i)),
        ],
        out_specs=pl.BlockSpec((1, 1), lambda i: (0, 0),
                               memory_space=pltpu.SMEM),
        scratch_shapes=[pltpu.VMEM((1, tile), jnp.float32)],
        compiler_params=pltpu.CompilerParams(
            dimension_semantics=("arbitrary",)),
    )(pred_t, tgt_t)
    return loss[0, 0] / bs


def yolo_loss_ref(prediction, target, *, S, B, C, l_coord, l_noobj):
    """Pure-JAX reference with identical masked-sum semantics."""
    D = 5 * B + C
    bs = prediction.shape[0]
    p = prediction.reshape(-1, D).astype(jnp.float32)
    t = target.reshape(-1, D).astype(jnp.float32)

    conf_t0 = t[:, 4:5]
    coo = conf_t0 > 0.0
    noo = conf_t0 == 0.0

    d4 = p[:, 4:5] - t[:, 4:5]
    d9 = p[:, 9:10] - t[:, 9:10]
    noo_loss = jnp.sum(jnp.where(noo, d4 * d4 + d9 * d9, 0.0))

    dc = p[:, 5 * B:] - t[:, 5 * B:]
    class_loss = jnp.sum(jnp.where(coo, dc * dc, 0.0))

    tx1 = t[:, 0:1] / S - 0.5 * t[:, 2:3]
    ty1 = t[:, 1:2] / S - 0.5 * t[:, 3:4]
    tx2 = t[:, 0:1] / S + 0.5 * t[:, 2:3]
    ty2 = t[:, 1:2] / S + 0.5 * t[:, 3:4]
    t_area = (tx2 - tx1) * (ty2 - ty1)

    ious, confs = [], []
    for b in range(B):
        o = 5 * b
        px1 = p[:, o:o + 1] / S - 0.5 * p[:, o + 2:o + 3]
        py1 = p[:, o + 1:o + 2] / S - 0.5 * p[:, o + 3:o + 4]
        px2 = p[:, o:o + 1] / S + 0.5 * p[:, o + 2:o + 3]
        py2 = p[:, o + 1:o + 2] / S + 0.5 * p[:, o + 3:o + 4]
        iw = jnp.maximum(jnp.minimum(px2, tx2) - jnp.maximum(px1, tx1), 0.0)
        ih = jnp.maximum(jnp.minimum(py2, ty2) - jnp.maximum(py1, ty1), 0.0)
        inter = iw * ih
        p_area = (px2 - px1) * (py2 - py1)
        denom = jnp.maximum(p_area + t_area - inter, 1e-12)
        ious.append(inter / denom)
        confs.append(p[:, o + 4:o + 5])

    max_iou, resp_conf = ious[0], confs[0]
    for b in range(1, B):
        better = ious[b] > max_iou
        resp_conf = jnp.where(better, confs[b], resp_conf)
        max_iou = jnp.where(better, ious[b], max_iou)
    dcontain = resp_conf - max_iou
    contain_loss = jnp.sum(jnp.where(coo, dcontain * dcontain, 0.0))

    loss = (l_coord * 0.0 + 2.0 * contain_loss + 0.0
            + l_noobj * noo_loss + class_loss)
    return loss / bs


if __name__ == "__main__":
    # Small shapes consistent with the module: bs=2, S=7, B=2, C=4 -> D=14.
    bs, S, B, C = 2, 7, 2, 4
    D = 5 * B + C
    l_coord, l_noobj = 5.0, 0.5

    key = jax.random.PRNGKey(0)
    kp, kt, kc = jax.random.split(key, 3)

    prediction = jax.random.uniform(kp, (bs, S, S, D), dtype=jnp.float32,
                                    minval=0.05, maxval=0.95)
    target = jax.random.uniform(kt, (bs, S, S, D), dtype=jnp.float32,
                                minval=0.05, maxval=0.95)
    # Object-presence mask: ~30% of cells contain an object; confidence
    # channels (4 and 9) set to 1.0 for object cells, 0.0 otherwise.
    obj = (jax.random.uniform(kc, (bs, S, S)) > 0.7).astype(jnp.float32)
    target = target.at[..., 4].set(obj)
    target = target.at[..., 9].set(obj)

    loss = yolo_loss(prediction, target, S=S, B=B, C=C,
                     l_coord=l_coord, l_noobj=l_noobj)
    loss = jax.block_until_ready(loss)

    ref = yolo_loss_ref(prediction, target, S=S, B=B, C=C,
                        l_coord=l_coord, l_noobj=l_noobj)
    ref = jax.block_until_ready(ref)

    assert jnp.allclose(loss, ref, rtol=1e-5, atol=1e-5), (loss, ref)
    print("KERNEL_OK")
</pallas_src>

<mosaic_0001>
module attributes {stable_mosaic.version = 11 : i64} {
  func.func @yolo_loss_kernel(%arg0: i32, %arg1: memref<14x128xf32, #tpu.memory_space<vmem>>, %arg2: memref<14x128xf32, #tpu.memory_space<vmem>>, %arg3: memref<1x1xf32, #tpu.memory_space<smem>>, %arg4: memref<1x128xf32, #tpu.memory_space<vmem>>) attributes {dimension_semantics = [#tpu.dimension_semantics<arbitrary>], iteration_bounds = array<i64: 1>, scalar_prefetch = 0 : i64, scratch_operands = 1 : i64, tpu.core_type = #tpu.core_type<tc>, window_params = [{transform_indices = @transform_0, window_bounds = array<i64: 14, 128>}, {transform_indices = @transform_1, window_bounds = array<i64: 14, 128>}, {transform_indices = @transform_2, window_bounds = array<i64: 1, 1>}]} {
    %c0_i32 = arith.constant 0 : i32
    %0 = arith.cmpi eq, %arg0, %c0_i32 : i32
    %1 = arith.extui %0 : i1 to i32
    %c0_i32_0 = arith.constant 0 : i32
    %2 = arith.cmpi ne, %1, %c0_i32_0 : i32
    scf.if %2 {
      %cst_35 = arith.constant 0.000000e+00 : f32
      %149 = vector.broadcast %cst_35 : f32 to vector<1x128xf32>
      %c0_36 = arith.constant 0 : index
      %c0_37 = arith.constant 0 : index
      %150 = vector.load %arg4[%c0_36, %c0_37] : memref<1x128xf32, #tpu.memory_space<vmem>>, vector<1x128xf32>
      tpu.vector_store %arg4[%c0_36, %c0_37], %149 {strides = array<i32>} : memref<1x128xf32, #tpu.memory_space<vmem>>, vector<1x128xf32>,
    } else {
    }
    %c0 = arith.constant 0 : index
    %c0_1 = arith.constant 0 : index
    %3 = vector.load %arg1[%c0, %c0_1] : memref<14x128xf32, #tpu.memory_space<vmem>>, vector<14x128xf32>
    %c0_2 = arith.constant 0 : index
    %c0_3 = arith.constant 0 : index
    %4 = vector.load %arg2[%c0_2, %c0_3] : memref<14x128xf32, #tpu.memory_space<vmem>>, vector<14x128xf32>
    %5 = vector.extract_strided_slice %4 {offsets = [4, 0], sizes = [1, 128], strides = [1, 1]} : vector<14x128xf32> to vector<1x128xf32>
    %c128_i32 = arith.constant 128 : i32
    %6 = arith.muli %arg0, %c128_i32 : i32
    %7 = tpu.iota {dimensions = array<i32: 1>} : vector<1x128xi32>
    %8 = vector.broadcast %6 : i32 to vector<1x128xi32>
    %9 = arith.addi %8, %7 : vector<1x128xi32>
    %c98_i32 = arith.constant 98 : i32
    %10 = vector.broadcast %c98_i32 : i32 to vector<1x128xi32>
    %11 = arith.cmpi slt, %9, %10 : vector<1x128xi32>
    %cst = arith.constant 0.000000e+00 : f32
    %12 = vector.broadcast %cst : f32 to vector<1x128xf32>
    %13 = arith.cmpf ogt, %5, %12 : vector<1x128xf32>
    %14 = arith.andi %13, %11 : vector<1x128xi1>
    %cst_4 = arith.constant 0.000000e+00 : f32
    %15 = vector.broadcast %cst_4 : f32 to vector<1x128xf32>
    %16 = arith.cmpf oeq, %5, %15 : vector<1x128xf32>
    %17 = arith.andi %16, %11 : vector<1x128xi1>
    %18 = vector.extract_strided_slice %3 {offsets = [4, 0], sizes = [1, 128], strides = [1, 1]} : vector<14x128xf32> to vector<1x128xf32>
    %19 = vector.extract_strided_slice %4 {offsets = [4, 0], sizes = [1, 128], strides = [1, 1]} : vector<14x128xf32> to vector<1x128xf32>
    %20 = arith.subf %18, %19 : vector<1x128xf32>
    %21 = vector.extract_strided_slice %3 {offsets = [9, 0], sizes = [1, 128], strides = [1, 1]} : vector<14x128xf32> to vector<1x128xf32>
    %22 = vector.extract_strided_slice %4 {offsets = [9, 0], sizes = [1, 128], strides = [1, 1]} : vector<14x128xf32> to vector<1x128xf32>
    %23 = arith.subf %21, %22 : vector<1x128xf32>
    %24 = arith.mulf %20, %20 : vector<1x128xf32>
    %25 = arith.mulf %23, %23 : vector<1x128xf32>
    %26 = arith.addf %24, %25 : vector<1x128xf32>
    %cst_5 = arith.constant 0.000000e+00 : f32
    %27 = vector.broadcast %cst_5 : f32 to vector<1x128xf32>
    %28 = arith.select %17, %26, %27 : vector<1x128xi1>, vector<1x128xf32>
    %29 = vector.extract_strided_slice %3 {offsets = [10, 0], sizes = [4, 128], strides = [1, 1]} : vector<14x128xf32> to vector<4x128xf32>
    %30 = vector.extract_strided_slice %4 {offsets = [10, 0], sizes = [4, 128], strides = [1, 1]} : vector<14x128xf32> to vector<4x128xf32>
    %31 = arith.subf %29, %30 : vector<4x128xf32>
    %32 = arith.mulf %31, %31 : vector<4x128xf32>
    %cst_6 = arith.constant 0.000000e+00 : f32
    %33 = vector.shape_cast %14 : vector<1x128xi1> to vector<1x128xi1>
    %34 = vector.broadcast %33 : vector<1x128xi1> to vector<4x128xi1>
    %35 = vector.broadcast %cst_6 : f32 to vector<4x128xf32>
    %36 = arith.select %34, %32, %35 : vector<4x128xi1>, vector<4x128xf32>
    %cst_7 = arith.constant dense<0.000000e+00> : vector<128xf32>
    %37 = vector.multi_reduction <add>, %36, %cst_7 [0] : vector<4x128xf32> to vector<128xf32>
    %38 = vector.shape_cast %37 : vector<128xf32> to vector<1x128xf32>
    %39 = vector.extract_strided_slice %4 {offsets = [0, 0], sizes = [1, 128], strides = [1, 1]} : vector<14x128xf32> to vector<1x128xf32>
    %cst_8 = arith.constant 0.142857149 : f32
    %40 = vector.broadcast %cst_8 : f32 to vector<1x128xf32>
    %41 = arith.mulf %39, %40 : vector<1x128xf32>
    %42 = vector.extract_strided_slice %4 {offsets = [1, 0], sizes = [1, 128], strides = [1, 1]} : vector<14x128xf32> to vector<1x128xf32>
    %cst_9 = arith.constant 0.142857149 : f32
    %43 = vector.broadcast %cst_9 : f32 to vector<1x128xf32>
    %44 = arith.mulf %42, %43 : vector<1x128xf32>
    %45 = vector.extract_strided_slice %4 {offsets = [2, 0], sizes = [1, 128], strides = [1, 1]} : vector<14x128xf32> to vector<1x128xf32>
    %cst_10 = arith.constant 5.000000e-01 : f32
    %46 = vector.broadcast %cst_10 : f32 to vector<1x128xf32>
    %47 = arith.mulf %46, %45 : vector<1x128xf32>
    %48 = vector.extract_strided_slice %4 {offsets = [3, 0], sizes = [1, 128], strides = [1, 1]} : vector<14x128xf32> to vector<1x128xf32>
    %cst_11 = arith.constant 5.000000e-01 : f32
    %49 = vector.broadcast %cst_11 : f32 to vector<1x128xf32>
    %50 = arith.mulf %49, %48 : vector<1x128xf32>
    %51 = arith.subf %41, %47 : vector<1x128xf32>
    %52 = arith.addf %41, %47 : vector<1x128xf32>
    %53 = arith.subf %44, %50 : vector<1x128xf32>
    %54 = arith.addf %44, %50 : vector<1x128xf32>
    %55 = arith.subf %52, %51 : vector<1x128xf32>
    %56 = arith.subf %54, %53 : vector<1x128xf32>
    %57 = arith.mulf %55, %56 : vector<1x128xf32>
    %58 = vector.extract_strided_slice %3 {offsets = [0, 0], sizes = [1, 128], strides = [1, 1]} : vector<14x128xf32> to vector<1x128xf32>
    %cst_12 = arith.constant 0.142857149 : f32
    %59 = vector.broadcast %cst_12 : f32 to vector<1x128xf32>
    %60 = arith.mulf %58, %59 : vector<1x128xf32>
    %61 = vector.extract_strided_slice %3 {offsets = [1, 0], sizes = [1, 128], strides = [1, 1]} : vector<14x128xf32> to vector<1x128xf32>
    %cst_13 = arith.constant 0.142857149 : f32
    %62 = vector.broadcast %cst_13 : f32 to vector<1x128xf32>
    %63 = arith.mulf %61, %62 : vector<1x128xf32>
    %64 = vector.extract_strided_slice %3 {offsets = [2, 0], sizes = [1, 128], strides = [1, 1]} : vector<14x128xf32> to vector<1x128xf32>
    %cst_14 = arith.constant 5.000000e-01 : f32
    %65 = vector.broadcast %cst_14 : f32 to vector<1x128xf32>
    %66 = arith.mulf %65, %64 : vector<1x128xf32>
    %67 = vector.extract_strided_slice %3 {offsets = [3, 0], sizes = [1, 128], strides = [1, 1]} : vector<14x128xf32> to vector<1x128xf32>
    %cst_15 = arith.constant 5.000000e-01 : f32
    %68 = vector.broadcast %cst_15 : f32 to vector<1x128xf32>
    %69 = arith.mulf %68, %67 : vector<1x128xf32>
    %70 = arith.subf %60, %66 : vector<1x128xf32>
    %71 = arith.addf %60, %66 : vector<1x128xf32>
    %72 = arith.subf %63, %69 : vector<1x128xf32>
    %73 = arith.addf %63, %69 : vector<1x128xf32>
    %74 = arith.minimumf %71, %52 : vector<1x128xf32>
    %75 = arith.maximumf %70, %51 : vector<1x128xf32>
    %76 = arith.subf %74, %75 : vector<1x128xf32>
    %cst_16 = arith.constant 0.000000e+00 : f32
    %77 = vector.broadcast %cst_16 : f32 to vector<1x128xf32>
    %78 = arith.maximumf %76, %77 : vector<1x128xf32>
    %79 = arith.minimumf %73, %54 : vector<1x128xf32>
    %80 = arith.maximumf %72, %53 : vector<1x128xf32>
    %81 = arith.subf %79, %80 : vector<1x128xf32>
    %cst_17 = arith.constant 0.000000e+00 : f32
    %82 = vector.broadcast %cst_17 : f32 to vector<1x128xf32>
    %83 = arith.maximumf %81, %82 : vector<1x128xf32>
    %84 = arith.mulf %78, %83 : vector<1x128xf32>
    %85 = arith.subf %71, %70 : vector<1x128xf32>
    %86 = arith.subf %73, %72 : vector<1x128xf32>
    %87 = arith.mulf %85, %86 : vector<1x128xf32>
    %88 = arith.addf %87, %57 : vector<1x128xf32>
    %89 = arith.subf %88, %84 : vector<1x128xf32>
    %cst_18 = arith.constant 9.99999996E-13 : f32
    %90 = vector.broadcast %cst_18 : f32 to vector<1x128xf32>
    %91 = arith.maximumf %89, %90 : vector<1x128xf32>
    %92 = arith.divf %84, %91 : vector<1x128xf32>
    %93 = vector.extract_strided_slice %3 {offsets = [4, 0], sizes = [1, 128], strides = [1, 1]} : vector<14x128xf32> to vector<1x128xf32>
    %94 = vector.extract_strided_slice %3 {offsets = [5, 0], sizes = [1, 128], strides = [1, 1]} : vector<14x128xf32> to vector<1x128xf32>
    %cst_19 = arith.constant 0.142857149 : f32
    %95 = vector.broadcast %cst_19 : f32 to vector<1x128xf32>
    %96 = arith.mulf %94, %95 : vector<1x128xf32>
    %97 = vector.extract_strided_slice %3 {offsets = [6, 0], sizes = [1, 128], strides = [1, 1]} : vector<14x128xf32> to vector<1x128xf32>
    %cst_20 = arith.constant 0.142857149 : f32
    %98 = vector.broadcast %cst_20 : f32 to vector<1x128xf32>
    %99 = arith.mulf %97, %98 : vector<1x128xf32>
    %100 = vector.extract_strided_slice %3 {offsets = [7, 0], sizes = [1, 128], strides = [1, 1]} : vector<14x128xf32> to vector<1x128xf32>
    %cst_21 = arith.constant 5.000000e-01 : f32
    %101 = vector.broadcast %cst_21 : f32 to vector<1x128xf32>
    %102 = arith.mulf %101, %100 : vector<1x128xf32>
    %103 = vector.extract_strided_slice %3 {offsets = [8, 0], sizes = [1, 128], strides = [1, 1]} : vector<14x128xf32> to vector<1x128xf32>
    %cst_22 = arith.constant 5.000000e-01 : f32
    %104 = vector.broadcast %cst_22 : f32 to vector<1x128xf32>
    %105 = arith.mulf %104, %103 : vector<1x128xf32>
    %106 = arith.subf %96, %102 : vector<1x128xf32>
    %107 = arith.addf %96, %102 : vector<1x128xf32>
    %108 = arith.subf %99, %105 : vector<1x128xf32>
    %109 = arith.addf %99, %105 : vector<1x128xf32>
    %110 = arith.minimumf %107, %52 : vector<1x128xf32>
    %111 = arith.maximumf %106, %51 : vector<1x128xf32>
    %112 = arith.subf %110, %111 : vector<1x128xf32>
    %cst_23 = arith.constant 0.000000e+00 : f32
    %113 = vector.broadcast %cst_23 : f32 to vector<1x128xf32>
    %114 = arith.maximumf %112, %113 : vector<1x128xf32>
    %115 = arith.minimumf %109, %54 : vector<1x128xf32>
    %116 = arith.maximumf %108, %53 : vector<1x128xf32>
    %117 = arith.subf %115, %116 : vector<1x128xf32>
    %cst_24 = arith.constant 0.000000e+00 : f32
    %118 = vector.broadcast %cst_24 : f32 to vector<1x128xf32>
    %119 = arith.maximumf %117, %118 : vector<1x128xf32>
    %120 = arith.mulf %114, %119 : vector<1x128xf32>
    %121 = arith.subf %107, %106 : vector<1x128xf32>
    %122 = arith.subf %109, %108 : vector<1x128xf32>
    %123 = arith.mulf %121, %122 : vector<1x128xf32>
    %124 = arith.addf %123, %57 : vector<1x128xf32>
    %125 = arith.subf %124, %120 : vector<1x128xf32>
    %cst_25 = arith.constant 9.99999996E-13 : f32
    %126 = vector.broadcast %cst_25 : f32 to vector<1x128xf32>
    %127 = arith.maximumf %125, %126 : vector<1x128xf32>
    %128 = arith.divf %120, %127 : vector<1x128xf32>
    %129 = vector.extract_strided_slice %3 {offsets = [9, 0], sizes = [1, 128], strides = [1, 1]} : vector<14x128xf32> to vector<1x128xf32>
    %130 = arith.cmpf ogt, %128, %92 : vector<1x128xf32>
    %131 = arith.select %130, %129, %93 : vector<1x128xi1>, vector<1x128xf32>
    %132 = arith.select %130, %128, %92 : vector<1x128xi1>, vector<1x128xf32>
    %133 = arith.subf %131, %132 : vector<1x128xf32>
    %134 = arith.mulf %133, %133 : vector<1x128xf32>
    %cst_26 = arith.constant 0.000000e+00 : f32
    %135 = vector.broadcast %cst_26 : f32 to vector<1x128xf32>
    %136 = arith.select %14, %134, %135 : vector<1x128xi1>, vector<1x128xf32>
    %cst_27 = arith.constant 2.000000e+00 : f32
    %137 = vector.broadcast %cst_27 : f32 to vector<1x128xf32>
    %138 = arith.mulf %137, %136 : vector<1x128xf32>
    %cst_28 = arith.constant 5.000000e-01 : f32
    %139 = vector.broadcast %cst_28 : f32 to vector<1x128xf32>
    %140 = arith.mulf %139, %28 : vector<1x128xf32>
    %141 = arith.addf %138, %140 : vector<1x128xf32>
    %142 = arith.addf %141, %38 : vector<1x128xf32>
    %c0_29 = arith.constant 0 : index
    %c0_30 = arith.constant 0 : index
    %143 = vector.load %arg4[%c0_29, %c0_30] : memref<1x128xf32, #tpu.memory_space<vmem>>, vector<1x128xf32>
    %144 = arith.addf %143, %142 : vector<1x128xf32>
    %c0_31 = arith.constant 0 : index
    %c0_32 = arith.constant 0 : index
    %145 = vector.load %arg4[%c0_31, %c0_32] : memref<1x128xf32, #tpu.memory_space<vmem>>, vector<1x128xf32>
    tpu.vector_store %arg4[%c0_31, %c0_32], %144 {strides = array<i32>} : memref<1x128xf32, #tpu.memory_space<vmem>>, vector<1x128xf32>,
    %c0_i32_33 = arith.constant 0 : i32
    %146 = arith.cmpi eq, %arg0, %c0_i32_33 : i32
    %147 = arith.extui %146 : i1 to i32
    %c0_i32_34 = arith.constant 0 : i32
    %148 = arith.cmpi ne, %147, %c0_i32_34 : i32
    scf.if %148 {
      %c0_35 = arith.constant 0 : index
      %c0_36 = arith.constant 0 : index
      %149 = vector.load %arg4[%c0_35, %c0_36] : memref<1x128xf32, #tpu.memory_space<vmem>>, vector<1x128xf32>
      %150 = vector.shape_cast %149 : vector<1x128xf32> to vector<1x1x128xf32>
      %cst_37 = arith.constant dense<0.000000e+00> : vector<1xf32>
      %151 = vector.multi_reduction <add>, %150, %cst_37 [1, 2] : vector<1x1x128xf32> to vector<1xf32>
      %152 = vector.shape_cast %151 : vector<1xf32> to vector<1x1x1xf32>
      %153 = vector.extract %152[0, 0, 0] : f32 from vector<1x1x1xf32>
      %c0_38 = arith.constant 0 : index
      %c0_39 = arith.constant 0 : index
      %154 = memref.load %arg3[%c0_38, %c0_39] : memref<1x1xf32, #tpu.memory_space<smem>>
      memref.store %153, %arg3[%c0_38, %c0_39] : memref<1x1xf32, #tpu.memory_space<smem>>
    } else {
    }
    return
  }
  func.func @transform_0(%arg0: i32) -> (i32, i32) {
    %c0_i32 = arith.constant 0 : i32
    %c0_i32_0 = arith.constant 0 : i32
    return %c0_i32, %arg0 : i32, i32
  }
  func.func @transform_1(%arg0: i32) -> (i32, i32) {
    %c0_i32 = arith.constant 0 : i32
    %c0_i32_0 = arith.constant 0 : i32
    return %c0_i32, %arg0 : i32, i32
  }
  func.func @transform_2(%arg0: i32) -> (i32, i32) {
    %c0_i32 = arith.constant 0 : i32
    %c0_i32_0 = arith.constant 0 : i32
    %c0_i32_1 = arith.constant 0 : i32
    return %c0_i32, %c0_i32_0 : i32, i32
  }
}

</mosaic_0001>

<bundles_post_ra>
// kernel: tpu_custom_call.1
= control target key start
LH: loop header
LB: loop body
LE: loop exit
PB: predicated region body
PF: predicated region fallthrough
CT: control target
= control target key end

     0   :  { %7 = vsyncpa [#allocation4], 0  ;;  %s404_s0 = inlined_call_operand.hbm [shape: f32[14,98], index: 0, kind: input, shape index: {}]   ;;  %s405_s1 = inlined_call_operand.hbm [shape: f32[14,98], index: 1, kind: input, shape index: {}]   ;;  %s406_s2 = inlined_call_operand.hbm [shape: f32[1,1], index: 2, kind: output, shape index: {}]  }
   0x1   :  { %8 = vsyncpa [#allocation7], 0 }
   0x2   :  { %9 = vsyncpa [#allocation5], 0  ;;  %s308_s9 = smov [#allocation3]   ;;  %s248_s13 = scalar_lea.hbm %s404_s0, 256 }
   0x3   :  { %s15_s10 = sshll.u32 %s308_s9, 4  ;;  %p249_p0 = scmp.ne.s32.totalorder %s404_s0, %s248_s13  ;;  %s16_s10 = int_to_ptr.vmem [resolvable:$true] %s15_s10 }
   0x4   :  { %p252_p1 = scmp.lt.u32.totalorder %s248_s13, %s404_s0 }
   0x6   :  { %p254_p2 = pnand %p252_p1, %p249_p0 }
   0x8   :  { %257 = shalt.err (!%p254_p2)
}
   0x9   :  { %s258_s18 = scalar_lea.vmem %s16_s10, 256  ;;  %p263_p4 = scmp.lt.s32.totalorder %s16_s10, %s16_s10 }
   0xa   :  { %p259_p3 = scmp.ne.s32.totalorder %s16_s10, %s258_s18  ;;  %p264_p5 = scmp.lt.s32.totalorder %s258_s18, %s258_s18 }
   0xc   :  { %p265_p6 = por %p264_p5, %p263_p4 }
   0xe   :  { %p266_p7 = pnand %p265_p6, %p259_p3 }
  0x10   :  { %269 = shalt.err (!%p266_p7)
}
  0x11   :  { %s309_s19 = smov 128   ;;  %s310_s20 = smov 8  }
  0x12   :  { %21 = dma.hbm_to_vmem [thread:$0]  %s404_s0, 256, %s16_s10, [#allocation4], %s309_s19, %s309_s19, %s310_s20  }
  0x13   :  { %s311_s23 = smov [#allocation6]   ;;  %s270_s27 = scalar_lea.hbm %s405_s1, 256 }
  0x14   :  { %s27_s24 = sshll.u32 %s311_s23, 4  ;;  %p271_p8 = scmp.ne.s32.totalorder %s405_s1, %s270_s27  ;;  %s28_s24 = int_to_ptr.vmem [resolvable:$true] %s27_s24 }
  0x15   :  { %p274_p9 = scmp.lt.u32.totalorder %s270_s27, %s405_s1 }
  0x17   :  { %p276_p10 = pnand %p274_p9, %p271_p8 }
  0x19   :  { %279 = shalt.err (!%p276_p10)
}
  0x1a   :  { %s280_s4 = scalar_lea.vmem %s28_s24, 256  ;;  %p285_p12 = scmp.lt.s32.totalorder %s28_s24, %s28_s24 }
  0x1b   :  { %p281_p11 = scmp.ne.s32.totalorder %s28_s24, %s280_s4  ;;  %p286_p13 = scmp.lt.s32.totalorder %s280_s4, %s280_s4 }
  0x1d   :  { %p287_p0 = por %p286_p13, %p285_p12 }
  0x1f   :  { %p288_p1 = pnand %p287_p0, %p281_p11 }
  0x21   :  { %291 = shalt.err (!%p288_p1)
}
  0x22   :  { %33 = dma.hbm_to_vmem [thread:$0]  %s405_s1, 256, %s28_s24, [#allocation7], %s309_s19, %s309_s19, %s310_s20  }
  0x23   :  { %302 = dma.done.wait [#allocation4], 256  }
  0x24   :  { %303 = vsyncadd [#allocation4], 4294967040 }
  0x25   :  { %304 = dma.done.wait [#allocation7], 256  }
  0x26   :  { %305 = vsyncadd [#allocation7], 4294967040  ;;  %v50_v0 = vlaneseq  ;;  %v312_v1 = vmov 0.0   ;;  %v357_v3 = vld [vmem:[#allocation3] sm:$0xff]  ;;  %v359_v4 = vld [vmem:[#allocation3 + $0x8] sm:$0x3f] }
  0x27   :  { %44 = vst [vmem:[#allocation2] sm:$0x1] %v312_v1  ;;  %v361_v5 = vld [vmem:[#allocation6] sm:$0xff]  ;;  %v99_v9 = vmul.f32 0.5, %v357_v3  ;;  %v98_v10 = vmul.f32 0.14285715, %v357_v3 }
  0x28   :  { %v355_v2 = vand.u32 127, %v50_v0  ;;  %vm55_vm1 = vcmp.gt.f32.partialorder %v361_v5, 0.0  ;;  %v365_v6 = vshrl.u32 %v50_v0, 7  ;;  %v86_v7 = vmul.f32 0.14285715, %v361_v5  ;;  %s292_s8 = scalar_lea.hbm %s406_s2, 16 }
  0x29   :  { %v87_v8 = vmul.f32 0.5, %v361_v5  ;;  %v123_v11 = vmul.f32 0.5, %v359_v4  ;;  %v101_v14 = vrot.slane %v99_v9, 2  ;;  %v48_v19 = vld [vmem:[#allocation6 + $0x8] sm:$0x3f]  ;;  %v313_v20 = vmov 0   ;;  %p293_p2 = scmp.ne.s32.totalorder %s406_s2, %s292_s8  ;;  %p296_p3 = scmp.lt.u32.totalorder %s292_s8, %s406_s2 }
  0x2a   :  { %vm54_vm0 = vcmp.lt.s32.totalorder %v355_v2, 98  ;;  %v71_v16 = vsub.s32 4, %v365_v6  ;;  %v60_v31 = vsub.f32 %v359_v4, %v48_v19  ;;  %vm78_vm4 = vcmask 1043456  }
  0x2b   :  { %vm374_vm2 = vmand %vm55_vm1, %vm54_vm0  ;;  %v89_v13 = vrot.slane %v87_v8, 2  ;;  %v125_v15 = vrot.slane %v123_v11, 2  ;;  %v103_v22 = vsub.f32 %v98_v10, %v101_v14  ;;  %v104_v23 = vadd.f32 %v101_v14, %v98_v10  ;;  %p298_p4 = pnand %p296_p3, %p293_p2 }
  0x2c   :  { %v68_v21 = vsel %vm374_vm2, 1, %v313_v20  ;;  %v62_v45 = vmul.f32 %v60_v31, %v60_v31  ;;  %v59_v8 = vsub.f32 %v357_v3, %v361_v5  ;;  %v168_v19 = vrot.slane %v357_v3, 7 }
  0x2d   :  { %v91_v17 = vsub.f32 %v86_v7, %v89_v13  ;;  %v92_v18 = vadd.f32 %v89_v13, %v86_v7  ;;  %v127_v25 = vsub.f32 %v98_v10, %v125_v15  ;;  %v128_v26 = vadd.f32 %v125_v15, %v98_v10 }
  0x2e   :  { %v113_v29 = vsub.f32 %v104_v23, %v103_v22  ;;  %v72_v32 = vrot.slane %v68_v21, %v71_v16  ;;  %v61_v13 = vmul.f32 %v59_v8, %v59_v8  ;;  %v64_v14 = vrot.slane %v62_v45, 5 }
  0x2f   :  { %v93_v24 = vsub.f32 %v92_v18, %v91_v17  ;;  %v105_v27 = vmin.f32 %v104_v23, %v92_v18  ;;  %v106_v28 = vmax.f32 %v103_v22, %v91_v17  ;;  %v130_v30 = vrot.slane %v92_v18, 3 }
  0x30   :  { %v134_v34 = vrot.slane %v91_v17, 3  ;;  %v115_v36 = vrot.slane %v113_v29, 1  ;;  %v147_v44 = vsub.f32 %v128_v26, %v127_v25  ;;  %vm73_vm3 = vcmp.eq.s32.totalorder %v72_v32, 1 }
  0x31   :  { %v95_v33 = vrot.slane %v93_v24, 1  ;;  %v107_v35 = vsub.f32 %v105_v27, %v106_v28  ;;  %v132_v37 = vmin.f32 %v104_v23, %v130_v30  ;;  %v139_v40 = vmin.f32 %v128_v26, %v130_v30 }
  0x32   :  { %v136_v39 = vmax.f32 %v103_v22, %v134_v34  ;;  %v140_v41 = vmax.f32 %v127_v25, %v134_v34  ;;  %v117_v43 = vmul.f32 %v115_v36, %v113_v29  ;;  %v149_v50 = vrot.slane %v147_v44, 1 }
  0x33   :  { %v97_v38 = vmul.f32 %v95_v33, %v93_v24  ;;  %v108_v42 = vmax.f32 %v107_v35, 0.0  ;;  %v74_v56 = vsel %vm73_vm3, %v62_v45, 0.0  ;;  %v165_v18 = vrot.slane %v359_v4, 4 }
  0x34   :  { %v137_v46 = vsub.f32 %v132_v37, %v136_v39  ;;  %v141_v47 = vsub.f32 %v139_v40, %v140_v41  ;;  %v151_v55 = vmul.f32 %v149_v50, %v113_v29  ;;  %v76_v61 = vrot.slane %v74_v56, 2 }
  0x35   :  { %v110_v48 = vrot.slane %v108_v42, 1  ;;  %v118_v49 = vadd.f32 %v117_v43, %v97_v38  ;;  %v153_v51 = vrot.slane %v97_v38, 3  ;;  %vm57_vm5 = vcmp.eq.f32.partialorder %v361_v5, 0.0  ;;  %v182_v38 = vld [vmem:[#allocation2] sm:$0x1] }
  0x36   :  { %v138_v52 = vmax.f32 %v137_v46, 0.0  ;;  %v142_v53 = vmax.f32 %v141_v47, 0.0  ;;  %v79_v1 = vsel %vm78_vm4, %v76_v61, 0.0  ;;  %v66_v21 = vadd.f32 %v64_v14, %v61_v13  ;;  %vm58_vm7 = vmand %vm57_vm5, %vm54_vm0 }
  0x37   :  { %v112_v54 = vmul.f32 %v110_v48, %v108_v42  ;;  %v155_v59 = vadd.f32 %v153_v51, %v151_v55  ;;  %v80_v7 = vrot.slane %v79_v1, 4  ;;  %v314_v29 = vmov 1966171168  }
  0x38   :  { %v144_v57 = vrot.slane %v142_v53, 1  ;;  %v67_v26 = vsel %vm58_vm7, %v66_v21, 0.0  ;;  %v186_v30 = vunpack.c.l.s4 %v314_v29  ;;  %vm206_vm8 = vcmask 1040384  }
  0x39   :  { %v119_v58 = vsub.f32 %v118_v49, %v112_v54  ;;  %v81_v9 = vadd.f32 %v80_v7, %v79_v1  ;;  %v179_v31 = vmul.f32 0.5, %v67_v26 }
  0x3a   :  { %v146_v60 = vmul.f32 %v144_v57, %v138_v52  ;;  %v187_v33 = vunpack.c.0.s8 %v186_v30 }
  0x3b   :  { %v120_v62 = vmax.f32 %v119_v58, 1e-12  ;;  %v82_v16 = vrot.slane %v81_v9, 2 }
  0x3c   :  { %v156_v63 = vsub.f32 %v155_v59, %v146_v60  ;;  %v190_v35 = vsub.s32 %v187_v33, %v365_v6 }
  0x3d   :  { %244 = vrcp.f32 %v120_v62  ;;  %v83_v22 = vadd.f32 %v82_v16, %v81_v9 }
  0x3e   :  { %v157_v0 = vmax.f32 %v156_v63, 1e-12 }
  0x3f   :  { %v84_v28 = vrot.slane %v83_v22, 1 }
  0x40   :  { %246 = vrcp.f32 %v157_v0 }
  0x41   :  { %v85_v5 = vadd.f32 %v84_v28, %v83_v22 }
  0x47   :  { %v245_v10 = vpop.eup %244 }
  0x48   :  { %v122_v11 = vmul.f32 %v245_v10, %v112_v54 }
  0x4a   :  { %v247_v15 = vpop.eup %246  ;;  %v161_v17 = vrot.slane %v122_v11, 3 }
  0x4b   :  { %v159_v20 = vmul.f32 %v247_v15, %v146_v60 }
  0x4d   :  { %vm163_vm6 = vcmp.gt.f32.partialorder %v159_v20, %v161_v17 }
  0x4e   :  { %v170_v23 = vsel %vm163_vm6, %v165_v18, %v168_v19  ;;  %v171_v24 = vsel %vm163_vm6, %v159_v20, %v161_v17 }
  0x4f   :  { %v172_v25 = vsub.f32 %v170_v23, %v171_v24 }
  0x51   :  { %v173_v27 = vmul.f32 %v172_v25, %v172_v25 }
  0x53   :  { %v175_v4 = vrot.slane %v173_v27, 1 }
  0x55   :  { %v177_v3 = vsel %vm374_vm2, %v175_v4, 0.0 }
  0x56   :  { %v178_v32 = vmul.f32 2.0, %v177_v3 }
  0x58   :  { %v180_v34 = vadd.f32 %v179_v31, %v178_v32 }
  0x5a   :  { %v181_v2 = vadd.f32 %v180_v34, %v85_v5 }
  0x5c   :  { %v184_v36 = vcombine.high %v181_v2, %v181_v2 }
  0x5e   :  { %v191_v37 = vrot.slane %v184_v36, %v190_v35 }
  0x60   :  { %v198_v39 = vrot.slane %v191_v37, %v190_v35 }
  0x62   :  { %v200_v40 = vadd.f32 %v198_v39, %v182_v38 }
  0x64   :  { %201 = vst [vmem:[#allocation2] sm:$0x1] %v200_v40 }
  0x6b   :  { %v205_v41 = vld [vmem:[#allocation2] sm:$0x1] }
  0x6c   :  { %v207_v42 = vsel %vm206_vm8, %v205_v41, 0.0 }
  0x6d   :  { %208 = vadd.xlane.f32.xlu0 %v207_v42 }
  0xfa   :  { %v209_v43 = vpop.xlane.xlu0 %208 }
  0xfb   :  { %v210_v12 = vrot.slane %v209_v43, 4 }
  0xfd   :  { %v211_v44 = vadd.f32 %v210_v12, %v209_v43 }
  0xff   :  { %v212_v45 = vrot.slane %v211_v44, 2 }
 0x101   :  { %v213_v46 = vadd.f32 %v212_v45, %v211_v44 }
 0x103   :  { %v214_v47 = vrot.slane %v213_v46, 1 }
 0x105   :  { %v215_v48 = vadd.f32 %v214_v47, %v213_v46 }
 0x107   :  { %234 = vpush %v215_v48 }
 0x138   :  { %s235_s1 = spop %234 }
 0x139   :  { %218 = sst [smem:[#allocation8]] %s235_s1 }
 0x13a   :  { %301 = shalt.err (!%p298_p4)
}
 0x13b   :  { %s315_s13 = smov [#allocation8]  }
 0x13c   :  { %226 = dma.smem_to_hbm %s315_s13, 16, %s406_s2, [#allocation5]  }
 0x13d   :  { %306 = dma.done.wait [#allocation5], 16  }
 0x13e   :  { %307 = vsyncadd [#allocation5], 4294967280 }
 0x13f   :  { %230 = sfence }
 0x140   :  { %231 = vsyncpa [#allocation4], 1 }
 0x141   :  { %232 = vsyncpa [#allocation7], 1 }
 0x142   :  { %233 = vsyncpa [#allocation5], 1 }

</bundles_post_ra>
